<compile_context>
chip_gen: v6e
topology: v6e:2x2x1
jax: 0.10.0
libtpu: 0.0.40
codegen_flags: <defaults>
</compile_context>

<pallas_src>
import math

import jax
import jax.numpy as jnp
from jax.experimental import pallas as pl
from jax.experimental.pallas import tpu as pltpu


# ---------------------------------------------------------------------------
# Kernel
# ---------------------------------------------------------------------------
def _add_pos_kernel(x_ref, pos_ref, o_ref):
    # x_ref / o_ref: (bt, sd_tile) batch tile; pos_ref: (1, sd_tile) table
    # slice.  The (1, sd_tile) row broadcasts over the batch-tile axis on the
    # VPU; this is the entire compute.
    o_ref[...] = x_ref[...] + pos_ref[...]


# ---------------------------------------------------------------------------
# Tiling helpers
# ---------------------------------------------------------------------------
def _round_up(x: int, m: int) -> int:
    return ((x + m - 1) // m) * m


def _sublane_rows(dtype) -> int:
    """Rows per packed sublane group: 8 for f32, 16 for bf16, 32 for int8/fp8."""
    return max(8, 32 // jnp.dtype(dtype).itemsize)


def _choose_tiles(B: int, SD: int, itemsize: int, sublane: int,
                  vmem_budget_bytes: int) -> tuple[int, int]:
    """Pick (batch_tile, sd_tile).

    Resident VMEM with the default pipeline is
        2 x (x block) + 2 x (out block) + 1 x (pos tile)
        = (4*bt + 1) * sd_tile * itemsize,
    so both tiles are sized from that total, not from a single block.
    """
    bt_min = B if B < 8 else 8

    # 1) Lane tile: keep full rows if even the minimum batch tile fits the
    #    budget, otherwise tile S*D in multiples of 128 (large ViT-L/H rows).
    if (4 * bt_min + 1) * SD * itemsize <= vmem_budget_bytes or SD <= 128:
        sd_tile = SD
    else:
        sd_tile = (vmem_budget_bytes // ((4 * bt_min + 1) * itemsize)) // 128 * 128
        sd_tile = max(128, min(sd_tile, SD))

    # 2) Batch tile from the remaining budget (4 pipelined buffers per block).
    avail = max(0, vmem_budget_bytes - sd_tile * itemsize)
    bt = avail // (4 * sd_tile * itemsize)
    if bt >= B or B < 8:
        bt = B
    else:
        if bt >= sublane:
            bt = (bt // sublane) * sublane   # dtype-aware sublane packing
        else:
            bt = max(8, (bt // 8) * 8)       # 8 is always layout-legal
        bt = min(bt, B)

    # 3) v7x: keep at least 2 batch grid steps so the "parallel" axis can be
    #    sharded across both TensorCores.
    if bt >= B and B >= 2 * sublane:
        bt = min(bt, _round_up(pl.cdiv(B, 2), sublane))

    # 4) If the whole problem still collapses to a single grid step, split the
    #    lane axis instead (still lane-dense: multiples of 128).
    if pl.cdiv(B, bt) * pl.cdiv(SD, sd_tile) == 1 and SD >= 256:
        sd_tile = _round_up(pl.cdiv(SD, 2), 128)

    return bt, sd_tile


# ---------------------------------------------------------------------------
# Wrapper
# ---------------------------------------------------------------------------
def add_positional_encoding(x: jax.Array,
                            pos_embedding: jax.Array,
                            *,
                            vmem_budget_bytes: int = 36 << 20,
                            batch_tile: int | None = None,
                            sd_tile: int | None = None,
                            alias_input: bool = True) -> jax.Array:
    """Returns x + pos_embedding with PyTorch-style type promotion.

    x: (B, S, D); pos_embedding: (1, S, D).

    `vmem_budget_bytes` is the *total resident* VMEM target (all pipelined
    buffers included).  The 36 MiB default stays under v7x's 64 MiB physical
    VMEM and is made legal on v5e/v6e by passing vmem_limit_bytes explicitly;
    on 128 MiB parts (v5e/v6e) it may be raised further for a few extra % of
    HBM roofline.  `batch_tile` / `sd_tile` override the automatic choice
    (tests).
    """
    B, S, D = x.shape
    assert pos_embedding.shape == (1, S, D)
    SD = S * D

    # Match torch type promotion (e.g. bf16 x + f32 table -> f32 out).
    out_dtype = jnp.result_type(x.dtype, pos_embedding.dtype)
    itemsize = jnp.dtype(out_dtype).itemsize
    sublane = _sublane_rows(out_dtype)

    bt_auto, sdt_auto = _choose_tiles(B, SD, itemsize, sublane, vmem_budget_bytes)
    bt = batch_tile if batch_tile is not None else bt_auto
    sdt = sd_tile if sd_tile is not None else sdt_auto
    assert bt == B or bt % 8 == 0, "batch tile must be a multiple of 8 or == B"
    assert sdt == SD or sdt % 128 == 0, "sd tile must be a multiple of 128 or == S*D"

    # Lane-dense 2-D views.
    x2d = x.astype(out_dtype).reshape(B, SD)
    pos2d = pos_embedding.astype(out_dtype).reshape(1, SD)

    n_sd = pl.cdiv(SD, sdt)
    n_b = pl.cdiv(B, bt)
    # Batch is the fastest (inner) axis so the pos block index is unchanged
    # across the whole inner sweep (no re-DMA of the table).
    grid = (n_sd, n_b)

    # Correct pipelined-VMEM accounting: 2x in + 2x out + 1x pos.
    block_bytes = bt * sdt * itemsize
    footprint = 4 * block_bytes + sdt * itemsize
    vmem_limit = int(max(16 << 20, footprint + (4 << 20)))

    cost = pl.CostEstimate(
        flops=B * SD,
        transcendentals=0,
        bytes_accessed=2 * B * SD * itemsize + SD * itemsize,
    )

    out2d = pl.pallas_call(
        _add_pos_kernel,
        out_shape=jax.ShapeDtypeStruct((B, SD), out_dtype),
        grid_spec=pltpu.PrefetchScalarGridSpec(
            num_scalar_prefetch=0,
            grid=grid,
            in_specs=[
                pl.BlockSpec((bt, sdt), lambda j, i: (i, j)),          # x tile
                pl.BlockSpec((1, sdt), lambda j, i: (0, j),            # pos row
                             pipeline_mode=pl.Buffered(1)),            # single-buffer
            ],
            out_specs=pl.BlockSpec((bt, sdt), lambda j, i: (i, j)),
        ),
        compiler_params=pltpu.CompilerParams(
            # Both axes are independent: lets v7x shard the grid across its
            # two TensorCores; near-zero effect on single-TC v5e/v6e.
            dimension_semantics=("parallel", "parallel"),
            vmem_limit_bytes=vmem_limit,
        ),
        # Output may be written in place over x (saves a B*S*D HBM allocation
        # whenever x is dead after this op; XLA copies otherwise).
        input_output_aliases=({0: 0} if alias_input else {}),
        cost_estimate=cost,
    )(x2d, pos2d)
    return out2d.reshape(B, S, D)


# ---------------------------------------------------------------------------
# Parameter / table construction (plain-JAX glue)
# ---------------------------------------------------------------------------
def make_sinusoidal_encoding(num_patches: int, embed_dim: int) -> jax.Array:
    """Replica of PositionalEncoding._get_sinusoidal_encoding (float32)."""
    assert embed_dim % 2 == 0, "sinusoidal encoding requires an even embed_dim"
    seq = num_patches + 1
    position = jnp.arange(seq, dtype=jnp.float32)[:, None]                   # (S, 1)
    div_term = jnp.exp(
        jnp.arange(0, embed_dim, 2, dtype=jnp.float32)
        * -(math.log(10000.0) / embed_dim)
    )                                                                         # (D/2,)
    pe = jnp.zeros((1, seq, embed_dim), dtype=jnp.float32)
    pe = pe.at[0, :, 0::2].set(jnp.sin(position * div_term))
    pe = pe.at[0, :, 1::2].set(jnp.cos(position * div_term))
    return pe


class PositionalEncodingPallas:
    """JAX/Pallas port of the PyTorch PositionalEncoding module."""

    def __init__(self, num_patches: int, embed_dim: int,
                 encoding_type: str = "learnable", key=None,
                 param_dtype=jnp.float32, use_pallas: bool = True):
        self.encoding_type = encoding_type
        self.num_patches = num_patches
        self.embed_dim = embed_dim
        # use_pallas=False returns a plain `x + pos` so XLA can fuse it into
        # neighbouring ops (preferred inside a full ViT graph).
        self.use_pallas = use_pallas
        if encoding_type == "learnable":
            if key is None:
                key = jax.random.PRNGKey(0)
            # torch.randn(1, num_patches + 1, embed_dim) equivalent; stored in
            # param_dtype up front (no per-call astype of the full table).
            self.pos_embedding = jax.random.normal(
                key, (1, num_patches + 1, embed_dim), dtype=jnp.float32
            ).astype(param_dtype)
        elif encoding_type == "sinusoidal":
            self.pos_embedding = make_sinusoidal_encoding(
                num_patches, embed_dim).astype(param_dtype)
        elif encoding_type == "relative":
            # Parameter exists in the module but is unused in forward().
            n = (2 * int(math.sqrt(num_patches)) - 1) ** 2
            self.relative_position_bias_table = jnp.zeros((n, embed_dim),
                                                          param_dtype)
            self.pos_embedding = None
        else:
            self.pos_embedding = None

    def __call__(self, x: jax.Array, **kwargs) -> jax.Array:
        if self.encoding_type in ("learnable", "sinusoidal"):
            if self.use_pallas:
                return add_positional_encoding(x, self.pos_embedding, **kwargs)
            return x + self.pos_embedding
        # 'relative' (and unknown types): forward is identity on x.
        return x


# ---------------------------------------------------------------------------
# Self-test
# ---------------------------------------------------------------------------
if __name__ == "__main__":
    key = jax.random.PRNGKey(0)
    k_x, k_param, k_big = jax.random.split(key, 3)

    B = 2
    num_patches = 15        # -> seq = 16 tokens (num_patches + 1)
    embed_dim = 32          # S*D = 512 -> lane-dense 2D view
    S = num_patches + 1

    x = jax.random.normal(k_x, (B, S, embed_dim), dtype=jnp.float32)

    # learnable encoding (auto tiling splits S*D into 2 parallel steps)
    mod_learn = PositionalEncodingPallas(num_patches, embed_dim,
                                         encoding_type="learnable", key=k_param)
    out_learn = jax.block_until_ready(mod_learn(x))
    ref_learn = x + mod_learn.pos_embedding
    assert out_learn.shape == (B, S, embed_dim)
    assert out_learn.dtype == jnp.float32
    assert jnp.allclose(out_learn, ref_learn, atol=1e-6)

    # sinusoidal encoding
    mod_sin = PositionalEncodingPallas(num_patches, embed_dim,
                                       encoding_type="sinusoidal")
    out_sin = jax.block_until_ready(mod_sin(x))
    assert jnp.allclose(out_sin, x + mod_sin.pos_embedding, atol=1e-6)

    # relative encoding: forward is a pass-through
    mod_rel = PositionalEncodingPallas(num_patches, embed_dim,
                                       encoding_type="relative")
    out_rel = jax.block_until_ready(mod_rel(x))
    assert jnp.array_equal(out_rel, x)

    # explicit 2-D tiling with masked edge blocks on both axes:
    # B=20 with bt=8 -> 3 batch steps (last masked), SD=512 with sd_tile=384
    # -> 2 lane steps (last masked)
    B_big = 20
    x_big = jax.random.normal(k_big, (B_big, S, embed_dim), dtype=jnp.float32)
    out_big = jax.block_until_ready(add_positional_encoding(
        x_big, mod_learn.pos_embedding, batch_tile=8, sd_tile=384))
    assert jnp.allclose(out_big, x_big + mod_learn.pos_embedding, atol=1e-6)

    # PyTorch-style promotion: bf16 x + f32 table -> f32 output
    out_promo = jax.block_until_ready(add_positional_encoding(
        x.astype(jnp.bfloat16), mod_learn.pos_embedding))
    assert out_promo.dtype == jnp.float32
    assert jnp.allclose(out_promo,
                        x.astype(jnp.bfloat16).astype(jnp.float32)
                        + mod_learn.pos_embedding, atol=1e-2)

    # bf16 end-to-end: table stored in bf16 at init, output stays bf16
    mod_bf16 = PositionalEncodingPallas(num_patches, embed_dim,
                                        encoding_type="learnable",
                                        key=k_param, param_dtype=jnp.bfloat16)
    x_bf16 = x.astype(jnp.bfloat16)
    out_bf16 = jax.block_until_ready(mod_bf16(x_bf16))
    assert out_bf16.dtype == jnp.bfloat16
    assert jnp.allclose(out_bf16.astype(jnp.float32),
                        (x_bf16 + mod_bf16.pos_embedding).astype(jnp.float32),
                        atol=1e-2)

    print("KERNEL_OK")
</pallas_src>

<mosaic_0001>
module attributes {stable_mosaic.version = 11 : i64} {
  func.func @_add_pos_kernel(%arg0: i32, %arg1: i32, %arg2: memref<2x256xf32, #tpu.memory_space<vmem>>, %arg3: memref<1x256xf32, #tpu.memory_space<vmem>>, %arg4: memref<2x256xf32, #tpu.memory_space<vmem>>) attributes {dimension_semantics = [#tpu.dimension_semantics<parallel>, #tpu.dimension_semantics<parallel>], iteration_bounds = array<i64: 2, 1>, scalar_prefetch = 0 : i64, scratch_operands = 0 : i64, tpu.core_type = #tpu.core_type<tc>, window_params = [{transform_indices = @transform_0, window_bounds = array<i64: 2, 256>}, {pipeline_mode = #tpu.pipeline_mode<synchronous>, transform_indices = @transform_1, window_bounds = array<i64: 1, 256>}, {transform_indices = @transform_2, window_bounds = array<i64: 2, 256>}]} {
    %c0 = arith.constant 0 : index
    %c0_0 = arith.constant 0 : index
    %0 = vector.load %arg2[%c0, %c0_0] : memref<2x256xf32, #tpu.memory_space<vmem>>, vector<2x256xf32>
    %c0_1 = arith.constant 0 : index
    %c0_2 = arith.constant 0 : index
    %1 = vector.load %arg3[%c0_1, %c0_2] : memref<1x256xf32, #tpu.memory_space<vmem>>, vector<1x256xf32>
    %2 = vector.broadcast %1 : vector<1x256xf32> to vector<2x256xf32>
    %3 = arith.addf %0, %2 : vector<2x256xf32>
    %c0_3 = arith.constant 0 : index
    %c0_4 = arith.constant 0 : index
    %4 = vector.load %arg4[%c0_3, %c0_4] : memref<2x256xf32, #tpu.memory_space<vmem>>, vector<2x256xf32>
    tpu.vector_store %arg4[%c0_3, %c0_4], %3 {strides = array<i32>} : memref<2x256xf32, #tpu.memory_space<vmem>>, vector<2x256xf32>,
    return
  }
  func.func @transform_0(%arg0: i32, %arg1: i32) -> (i32, i32) {
    %c0_i32 = arith.constant 0 : i32
    return %arg1, %arg0 : i32, i32
  }
  func.func @transform_1(%arg0: i32, %arg1: i32) -> (i32, i32) {
    %c0_i32 = arith.constant 0 : i32
    %c0_i32_0 = arith.constant 0 : i32
    return %c0_i32, %arg0 : i32, i32
  }
  func.func @transform_2(%arg0: i32, %arg1: i32) -> (i32, i32) {
    %c0_i32 = arith.constant 0 : i32
    return %arg1, %arg0 : i32, i32
  }
}

</mosaic_0001>

<bundles_post_ra>
// kernel: tpu_custom_call.1
= control target key start
LH: loop header
LB: loop body
LE: loop exit
PB: predicated region body
PF: predicated region fallthrough
CT: control target
= control target key end

     0   :  { %7 = vsyncpa [#allocation3], 0  ;;  %s687_s0 = inlined_call_operand.hbm [shape: f32[2,512], index: 0, kind: input, shape index: {}, may-alias: {0,2}]   ;;  %s688_s1 = inlined_call_operand.vmem [shape: f32[1,512], index: 1, kind: input, shape index: {}]   ;;  %s689_s2 = inlined_call_operand.hbm [shape: f32[2,512], index: 2, kind: output, shape index: {}, may-alias: {0,2}]  }
   0x1   :  { %9 = vsyncpa [#allocation3 + $0x1], 0 }
   0x2   :  { %10 = vsyncpa [#allocation4], 0 }
   0x3   :  { %12 = vsyncpa [#allocation4 + $0x1], 0  ;;  %s543_s9 = smov 0   ;;  %s545_s10 = smov 0  }
   0x4   :  { %s547_s11 = smov 0   ;;  %s549_s12 = smov 0  }
   0x5   :  { %s551_s13 = smov 0   ;;  %s553_s14 = smov 0  }
   0x6 LB: > { %s334_s15 = sadd.s32 4294967295, %s523_s14   ;;  %s335_s16 = sadd.s32 4294967294, %s523_s14   ;;  %s523_s14 = sphi %s553_s14, %s18_s14   ;;  %s519_s13 = sphi %s551_s13, %s701_s13   ;;  %s515_s12 = sphi %s549_s12, %s700_s12   ;;  %s511_s11 = sphi %s547_s11, %s699_s11   ;;  %s507_s10 = sphi %s545_s10, %s698_s10   ;;  %s503_s9 = sphi %s543_s9, %s697_s9  }
   0x7   : > { %s30_s17 = sadd.s32 1, %s519_s13  ;;  %s39_s18 = sadd.s32 1, %s511_s11 }
   0x8   : > { %p32_p0 = scmp.ge.s32.totalorder %s30_s17, 2  ;;  %p46_p1 = scmp.ne.s32.totalorder %s511_s11, %s507_s10 }
   0x9   : > { %p47_p2 = scmp.eq.s32.totalorder %s523_s14, 0  ;;  %p52_p3 = scmp.ne.s32.totalorder %s507_s10, %s503_s9 }
   0xa   : > { %s703_s17 = smov (%p32_p0, %s30_s17), 0  ;;  %p53_p5 = scmp.eq.s32.totalorder %s334_s15, 0 }
   0xb   : > { %p584_p4 = por %p47_p2, %p46_p1  ;;  %s35_s20 = ssub.s32 %s519_s13, %s703_s17 }
   0xc   : > { %p104_p6 = scmp.eq.s32.totalorder %s334_s15, 1  ;;  %p37_p7 = scmp.eq.s32.totalorder %s35_s20, 0 }
   0xd   : > { %p590_p8 = por %p53_p5, %p52_p3  ;;  %p110_p10 = scmp.eq.s32.totalorder %s335_s16, 1 }
   0xe   : > { %p594_p9 = por %p104_p6, %p46_p1  ;;  %p364_p13 = scmp.lt.s32.totalorder %s523_s14, 2 }
   0xf   : > { %s599_s23 = scalar_select %p37_p7, %s511_s11, %s39_s18  }
  0x10   : > { %p601_p11 = por %p110_p10, %p52_p3  ;;  %s138_s25 = sand.u32 1, %s511_s11  }
  0x11   : > { %s338_s26 = sshll.u32 %s138_s25, 2  ;;  %s350_s27 = sshll.u32 %s519_s13, 6 }
  0x12   : > { %s693_s24 = scalar_select %p601_p11, 1, 0 }
  0x13   : > { %s150_s30 = scalar_lea.hbm %s687_s0, %s350_s27  ;;  %s142_s3 = scalar_lea.vmem [#allocation2], %s338_s26 }
  0x14   : > { %s152_s4 = sshll.u32 %s142_s3, 4  ;;  %p614_p0 = pnand %p364_p13, %p584_p4  ;;  %s153_s4 = int_to_ptr.vmem [resolvable:$true] %s152_s4 }
  0x15   : > { %p341_p1 = scmp.ge.s32.totalorder %s523_s14, 1  ;;  %p157_p2 = scmp.lt.s32.totalorder %s523_s14, 3 }
  0x16   : > { %s139_s6 = scalar_lea.sflag [#allocation3], %s138_s25  ;;  %p417_p3 = pneg %p614_p0 }
  0x17   : > { %s428_s7 = scalar_lea.vmem %s153_s4, 64  ;;  %s525_s8 = smov [#allocation2]  }
  0x18   : > { %p429_p5 = scmp.ne.s32.totalorder %s153_s4, %s428_s7  ;;  %s433_s15 = sshll.u32 %s525_s8, 4  ;;  %s434_s15 = int_to_ptr.vmem [resolvable:$false] %s433_s15 }
  0x19   : > { %s435_s16 = scalar_lea.vmem %s434_s15, 128  ;;  %p436_p10 = scmp.lt.s32.totalorder %s153_s4, %s434_s15 }
  0x1a   : > { %p431_p6 = pnand %p429_p5, %p417_p3  ;;  %p437_p12 = scmp.lt.s32.totalorder %s435_s16, %s428_s7 }
  0x1c   : > { %p432_p7 = pneg %p431_p6  ;;  %p438_p4 = por %p437_p12, %p436_p10 }
  0x1e   : > { %p439_p13 = pnand %p438_p4, %p432_p7 }
  0x20   : > { %442 = shalt.err (!%p439_p13)
}
  0x21   : > { %359 = dma.hbm_to_vmem [thread:$0]  (!%p614_p0), %s150_s30, 64, %s153_s4, %s139_s6  }
  0x22   : > { %p158_p11 = pnand %p341_p1, %p157_p2 }
  0x23   : > { %s629_s18 = sand.u32 (!%p158_p11), 1, %s507_s10  }
  0x24   : > { %161 = sbr.rel (%p158_p11) target bundleno = 69 (0x45), region = 28  ;;  %s342_s19 = sshll.u32 (!%p158_p11), %s629_s18, 2 }
  0x25   : > { %s164_s20 = scalar_lea.sflag (!%p158_p11), [#allocation3], %s629_s18  ;;  %s167_s25 = scalar_lea.vmem (!%p158_p11), [#allocation2], %s342_s19 }
  0x29   : > { %494 = dma.done.wait (%p590_p8), %s164_s20, 64  }
  0x2a   : > { %496 = vsyncadd (%p590_p8), %s164_s20, 4294967232  ;;  %s344_s26 = sshll.u32 %s515_s12, 1  ;;  %v202_v0 = vlaneseq  ;;  %v526_v1 = vmov 1983009808   ;;  %s191_s21 = scalar_lea.vmem [#allocation5], %s342_s19 }
  0x2b   : > { %p194_p12 = scmp.lt.s32.totalorder %s344_s26, 3  ;;  %v212_v2 = vunpack.c.l.s4 %v526_v1  ;;  %s238_s30 = sshll.u32 %s191_s21, 4  ;;  %v199_v12 = vld [vmem:[%s167_s25] sm:$0xf]  ;;  %s642_s30 = int_to_ptr.vmem [resolvable:$true] %s238_s30 }
  0x2c   : > { %v203_v3 = vshrl.u32 %v202_v0, 7  ;;  %s351_s3 = sshll.u32 %s515_s12, 6  ;;  %s222_s7 = scalar_lea.sflag [#allocation4], %s629_s18 }
  0x2d   : > { %s705_s26 = smov (!%p194_p12, %s344_s26), 3  ;;  %v213_v6 = vunpack.c.0.s8 %v212_v2  ;;  %s236_s6 = scalar_lea.hbm %s689_s2, %s351_s3 }
  0x2e   : > { %v204_v4 = vsub.s32 0, %v203_v3  ;;  %v208_v5 = vsub.s32 1, %v203_v3  ;;  %s196_s29 = scalar_lea.vmem %s688_s1, %s705_s26  ;;  %s443_s8 = scalar_lea.vmem %s642_s30, 64 }
  0x2f   : > { %v200_v7 = vld [vmem:[%s196_s29] sm:$0x3]  ;;  %v216_v10 = vsub.s32 %v213_v6, %v203_v3  ;;  %p444_p8 = scmp.ne.s32.totalorder %s642_s30, %s443_s8  ;;  %s527_s15 = smov [#allocation5]  }
  0x30   : > { %v205_v8 = vrot.slane %v200_v7, %v204_v4  ;;  %v209_v9 = vrot.slane %v200_v7, %v208_v5  ;;  %s447_s12 = sshll.u32 %s527_s15, 4  ;;  %s448_s12 = int_to_ptr.vmem [resolvable:$false] %s447_s12 }
  0x31   : > { %p445_p11 = pnand %p444_p8, %p594_p9  ;;  %s449_s16 = scalar_lea.vmem %s448_s12, 128 }
  0x32   : > { %v210_v11 = vcombine.low %v205_v8, %v209_v9  ;;  %p450_p1 = scmp.lt.s32.totalorder %s642_s30, %s448_s12  ;;  %p451_p2 = scmp.lt.s32.totalorder %s449_s16, %s443_s8 }
  0x33   : > { %p446_p0 = pneg %p445_p11 }
  0x34   : > { %v217_v13 = vrot.slane %v210_v11, %v216_v10  ;;  %p452_p3 = por %p451_p2, %p450_p1 }
  0x36   : > { %v219_v14 = vadd.f32 %v217_v13, %v199_v12  ;;  %p453_p5 = pnand %p452_p3, %p446_p0 }
  0x38   : > { %220 = vst [vmem:[%s191_s21] sm:$0xf] %v219_v14 }
  0x39   : > { %456 = shalt.err (!%p453_p5)
}
  0x3a   : > { %s457_s19 = scalar_lea.hbm %s236_s6, 64  ;;  %s461_s25 = scalar_lea.hbm %s689_s2, 128 }
  0x3b   : > { %p458_p6 = scmp.ne.s32.totalorder %s236_s6, %s457_s19  ;;  %p462_p4 = scmp.lt.s32.totalorder %s236_s6, %s689_s2 }
  0x3c   : > { %p463_p13 = scmp.lt.s32.totalorder %s461_s25, %s457_s19 }
  0x3d   : > { %p459_p7 = pnand %p458_p6, %p594_p9 }
  0x3e   : > { %p464_p12 = por %p463_p13, %p462_p4 }
  0x3f   : > { %p460_p10 = pneg %p459_p7 }
  0x41   : > { %p465_p8 = pnand %p464_p12, %p460_p10 }
  0x43   : > { %468 = shalt.err (!%p465_p8)
}
  0x44   : > { %354 = dma.vmem_to_hbm [thread:$0]  (%p594_p9), %s642_s30, 64, %s236_s6, %s222_s7  }
  0x45 PF: > { %s250_s28 = sand.u32 1, %s503_s9   ;;  %p695_p11 = scmp.ne.s32.totalorder %s693_s24, 0 }
  0x46   : > { %p696_p0 = scmp.ge.s32.totalorder %s523_s14, 2  ;;  %s251_s29 = scalar_lea.sflag [#allocation4], %s250_s28 }
  0x48   : > { %p361_p1 = pnand %p696_p0, %p695_p11 }
  0x4a   : > { %p362_p2 = pneg %p361_p1 }
  0x4c   : > { %498 = dma.done.wait (%p362_p2), %s251_s29, 64  }
  0x4d   : > { %500 = vsyncadd (%p362_p2), %s251_s29, 4294967232  ;;  %s18_s14 = sadd.s32 1, %s523_s14   ;;  %s697_s9 = smov %s507_s10 }
  0x4e   : > { %p15_p3 = scmp.ge.s32.totalorder %s18_s14, 4   ;;  %s698_s10 = smov %s511_s11 }
  0x4f   : > { %s699_s11 = smov %s599_s23  ;;  %s700_s12 = smov %s519_s13 }
  0x50   : > { %s701_s13 = smov %s703_s17  ;;  %17 = sbr.rel (!%p15_p3) target bundleno = 6 (0x6), region = 76 }
  0x55   :  { %256 = vsyncpa [#allocation3], 1 }
  0x56   :  { %258 = vsyncpa [#allocation3 + $0x1], 1 }
  0x57   :  { %259 = vsyncpa [#allocation4], 1 }
  0x58   :  { %261 = vsyncpa [#allocation4 + $0x1], 1 }

</bundles_post_ra>
